<compile_context>
chip_gen: v5e
topology: v5e:2x2
jax: 0.10.0
libtpu: 0.0.40
codegen_flags: <defaults>
</compile_context>

<pallas_src>
import jax
import jax.numpy as jnp
from jax.experimental import pallas as pl
from jax.experimental.pallas import tpu as pltpu

# --- hyperparameters implied by the module (small, synthetic) ---------------
H_SIZE = 32     # args.h_size
Z_SIZE = 8      # args.z_size (unused by forward, kept for completeness)
OBS_SIZE = 16   # obs_size
BATCH = 2

_SUBLANE = 8          # sublane count of an f32 vreg
_MAX_TB = 2048        # batch-tile cap (amortizes ~0.35us per-grid-step cost)
_PALLAS_MIN_BATCH = 256  # below this, a plain fused XLA dot wins outright


def _round_up(x, m):
    return ((x + m - 1) // m) * m


def _linear_kernel(x_ref, w_ref, b_ref, o_ref):
    # x: [TB, H]  w: [H, OBS]  b: [1, OBS]  ->  o: [TB, OBS]
    acc = jnp.dot(x_ref[...], w_ref[...], preferred_element_type=jnp.float32)
    o_ref[...] = (acc + b_ref[...]).astype(o_ref.dtype)


@jax.jit
def forward_pallas(hq_tm1, w_o, b_o):
    """y = hq_tm1 @ w_o + b_o, as a single pallas_call on unpadded shapes.

    w_o is [h_size, obs_size] (already transposed relative to PyTorch's
    [out, in] Linear weight); b_o is [obs_size].
    """
    batch, h = hq_tm1.shape
    obs = w_o.shape[1]

    if batch <= _MAX_TB:
        # One tile covering the whole batch: block dim == full array extent,
        # which is always a legal BlockSpec regardless of (8,128) alignment.
        tb = batch
    else:
        # Split the batch roughly in half (balances v7x's 2 TensorCores),
        # rounded up to a sublane multiple, capped by _MAX_TB.  The last
        # block may be partial; Pallas masks its out-of-bounds writes.
        tb = min(_MAX_TB, _round_up(pl.cdiv(batch, 2), _SUBLANE))

    grid = (pl.cdiv(batch, tb),)
    b2d = b_o.reshape(1, obs)  # metadata-only under jit; no pad, no new buffer

    return pl.pallas_call(
        _linear_kernel,
        out_shape=jax.ShapeDtypeStruct((batch, obs), hq_tm1.dtype),
        grid=grid,
        in_specs=[
            # Activations: tiled along the batch axis only.
            pl.BlockSpec((tb, h), lambda i: (i, 0)),
            # Weights / bias: same block for every grid step -> VMEM-resident,
            # DMA'd from HBM exactly once per call.
            pl.BlockSpec((h, obs), lambda i: (0, 0)),
            pl.BlockSpec((1, obs), lambda i: (0, 0)),
        ],
        out_specs=pl.BlockSpec((tb, obs), lambda i: (i, 0)),
        compiler_params=pltpu.CompilerParams(
            # No-op on single-TC v5e/v6e; lets v7x shard the batch tiles.
            dimension_semantics=("parallel",),
        ),
    )(hq_tm1, w_o, b2d)


@jax.jit
def _forward_xla(hq_tm1, w_o, b_o):
    return hq_tm1 @ w_o + b_o


def forward(hq_tm1, w_o, b_o):
    """Production entry point: tiny batches go to a fused XLA dot (the whole
    problem is ~1 KFLOP and dispatch-bound); larger batches use the Pallas
    kernel."""
    if hq_tm1.shape[0] < _PALLAS_MIN_BATCH:
        return _forward_xla(hq_tm1, w_o, b_o)
    return forward_pallas(hq_tm1, w_o, b_o)


def forward_ref(hq_tm1, w_o, b_o):
    # Pure-JAX reference of the same computation.
    return hq_tm1 @ w_o + b_o


if __name__ == "__main__":
    key = jax.random.PRNGKey(0)
    k_x, k_w, k_b, k_x2 = jax.random.split(key, 4)

    # Deterministic init of the `o` Linear (stored as [h_size, obs_size]).
    # Mimic PyTorch's uniform(-1/sqrt(in), 1/sqrt(in)) init.
    bound = 1.0 / (H_SIZE ** 0.5)
    w_o = jax.random.uniform(
        k_w, (H_SIZE, OBS_SIZE), minval=-bound, maxval=bound, dtype=jnp.float32
    )
    b_o = jax.random.uniform(
        k_b, (OBS_SIZE,), minval=-bound, maxval=bound, dtype=jnp.float32
    )

    # --- primary check: module-sized input [batch=2, h_size=32] -------------
    # Call the Pallas kernel directly (grid=1, tb=2) so the kernel itself is
    # exercised even though the dispatcher would route this to plain XLA.
    hq_tm1 = jax.random.normal(k_x, (BATCH, H_SIZE), dtype=jnp.float32)
    out = jax.block_until_ready(forward_pallas(hq_tm1, w_o, b_o))
    ref = forward_ref(hq_tm1, w_o, b_o)
    assert out.shape == (BATCH, OBS_SIZE)
    assert jnp.allclose(out, ref, atol=1e-5, rtol=1e-5)

    # Dispatcher sanity at the native size (takes the XLA fast path).
    out_d = jax.block_until_ready(forward(hq_tm1, w_o, b_o))
    assert jnp.allclose(out_d, ref, atol=1e-5, rtol=1e-5)

    # --- secondary check: multi-tile batch exercising partial-block masking --
    # 2500 > _MAX_TB -> tb = round_up(1250, 8) = 1256, grid = 2, last block
    # holds only 1244 real rows (out-of-bounds rows are masked on store).
    big_b = 2500
    hq_big = jax.random.normal(k_x2, (big_b, H_SIZE), dtype=jnp.float32)
    out_big = jax.block_until_ready(forward(hq_big, w_o, b_o))
    ref_big = forward_ref(hq_big, w_o, b_o)
    assert out_big.shape == (big_b, OBS_SIZE)
    assert jnp.allclose(out_big, ref_big, atol=1e-5, rtol=1e-5)

    # TODO(synk): gru / zp / zq parameters from __init__ are not used by
    # forward(), so they are intentionally not materialized here.
    print("KERNEL_OK")
</pallas_src>

<mosaic_0001>
module attributes {stable_mosaic.version = 11 : i64} {
  func.func @_linear_kernel(%arg0: i32, %arg1: memref<2x32xf32, #tpu.memory_space<vmem>>, %arg2: memref<32x16xf32, #tpu.memory_space<vmem>>, %arg3: memref<1x16xf32, #tpu.memory_space<vmem>>, %arg4: memref<2x16xf32, #tpu.memory_space<vmem>>) attributes {dimension_semantics = [#tpu.dimension_semantics<parallel>], iteration_bounds = array<i64: 1>, scalar_prefetch = 0 : i64, scratch_operands = 0 : i64, tpu.core_type = #tpu.core_type<tc>, window_params = [{transform_indices = @transform_0, window_bounds = array<i64: 2, 32>}, {pipeline_mode = #tpu.pipeline_mode<synchronous>, transform_indices = @transform_1, window_bounds = array<i64: 32, 16>}, {pipeline_mode = #tpu.pipeline_mode<synchronous>, transform_indices = @transform_2, window_bounds = array<i64: 1, 16>}, {transform_indices = @transform_3, window_bounds = array<i64: 2, 16>}]} {
    %c0 = arith.constant 0 : index
    %c0_0 = arith.constant 0 : index
    %0 = vector.load %arg1[%c0, %c0_0] : memref<2x32xf32, #tpu.memory_space<vmem>>, vector<2x32xf32>
    %c0_1 = arith.constant 0 : index
    %c0_2 = arith.constant 0 : index
    %1 = vector.load %arg2[%c0_1, %c0_2] : memref<32x16xf32, #tpu.memory_space<vmem>>, vector<32x16xf32>
    %cst = arith.constant dense<0.000000e+00> : vector<2x16xf32>
    %2 = tpu.matmul %0, %1, %cst {dimension_numbers = #tpu.dot_dimension_numbers<[1], [0], [0], [1], [0, 0, 1, 1], [], []>} : vector<2x32xf32>, vector<32x16xf32>, vector<2x16xf32> -> vector<2x16xf32>
    %c0_3 = arith.constant 0 : index
    %c0_4 = arith.constant 0 : index
    %3 = vector.load %arg3[%c0_3, %c0_4] : memref<1x16xf32, #tpu.memory_space<vmem>>, vector<1x16xf32>
    %4 = vector.broadcast %3 : vector<1x16xf32> to vector<2x16xf32>
    %5 = arith.addf %2, %4 : vector<2x16xf32>
    %c0_5 = arith.constant 0 : index
    %c0_6 = arith.constant 0 : index
    %6 = vector.load %arg4[%c0_5, %c0_6] : memref<2x16xf32, #tpu.memory_space<vmem>>, vector<2x16xf32>
    tpu.vector_store %arg4[%c0_5, %c0_6], %5 {strides = array<i32>} : memref<2x16xf32, #tpu.memory_space<vmem>>, vector<2x16xf32>,
    return
  }
  func.func @transform_0(%arg0: i32) -> (i32, i32) {
    %c0_i32 = arith.constant 0 : i32
    %c0_i32_0 = arith.constant 0 : i32
    return %arg0, %c0_i32 : i32, i32
  }
  func.func @transform_1(%arg0: i32) -> (i32, i32) {
    %c0_i32 = arith.constant 0 : i32
    %c0_i32_0 = arith.constant 0 : i32
    %c0_i32_1 = arith.constant 0 : i32
    return %c0_i32, %c0_i32_0 : i32, i32
  }
  func.func @transform_2(%arg0: i32) -> (i32, i32) {
    %c0_i32 = arith.constant 0 : i32
    %c0_i32_0 = arith.constant 0 : i32
    %c0_i32_1 = arith.constant 0 : i32
    return %c0_i32, %c0_i32_0 : i32, i32
  }
  func.func @transform_3(%arg0: i32) -> (i32, i32) {
    %c0_i32 = arith.constant 0 : i32
    %c0_i32_0 = arith.constant 0 : i32
    return %arg0, %c0_i32 : i32, i32
  }
}

</mosaic_0001>

<bundles_post_ra>
// kernel: forward_pallas.1
= control target key start
LH: loop header
LB: loop body
LE: loop exit
PB: predicated region body
PF: predicated region fallthrough
CT: control target
= control target key end

     0   :  { %s137_s0 = inlined_call_operand.vmem [shape: f32[2,32], index: 0, kind: input, shape index: {}]   ;;  %s138_s1 = inlined_call_operand.vmem [shape: f32[32,16], index: 1, kind: input, shape index: {}]   ;;  %s139_s2 = inlined_call_operand.vmem [shape: f32[1,16], index: 2, kind: input, shape index: {}]   ;;  %s140_s3 = inlined_call_operand.hbm [shape: f32[2,16], index: 3, kind: output, shape index: {}]  }
   0x1   :  { %v19_v0 = vld [vmem:[%s138_s1 + $0x18] sm:$0xff]  ;;  %v18_v1 = vld [vmem:[%s138_s1 + $0x10] sm:$0xff]  ;;  %v17_v2 = vld [vmem:[%s138_s1 + $0x8] sm:$0xff] }
   0x2   :  { %40 = vmatpush.msra.mxu0 %v19_v0 }
   0x3   :  { %8 = vsyncpa [#allocation3], 0  ;;  %v16_v3 = vld [vmem:[%s138_s1] sm:$0xff]  ;;  %vm24_vm0 = vcmask 261120   ;;  %s95_s24 = smov [#allocation2]   ;;  %s57_s28 = sshll.u32 %s140_s3, 4  ;;  %s58_s28 = int_to_ptr.hbm [resolvable:$true] %s57_s28 }
   0x4   :  { %41 = vmatpush.msra.mxu0 %v18_v1  ;;  %v15_v4 = vld [vmem:[%s137_s0] sm:$0x3]  ;;  %s55_s25 = sshll.u32 %s95_s24, 4  ;;  %vm48_vm1 = vcmask 123904   ;;  %s56_s25 = int_to_ptr.vmem [resolvable:$true] %s55_s25 }
   0x5   :  { %v68_v5 = vld [vmem:[%s139_s2] ss:$0 sm:$0xff] }
   0x6   :  { %42 = vmatpush.msra.mxu0 %v17_v2 }
   0x8   :  { %43 = vmatpush.msra.mxu0 %v16_v3 }
   0x9   :  { %66 = vmatmul.msk.f32.vlgmr.msra.gmra.mxu0 %vm24_vm0, %v15_v4 }
  0x86   :  { %v45_v6 = vpop.f32.mrf.mxu0 }
  0x87   :  { %v46_v7 = vadd.f32 %v68_v5, %v45_v6 }
  0x89   :  { %49 = vst.msk [vmem:[#allocation2] sm:$0x3] %vm48_vm1, %v46_v7 }
  0x8a   :  { %60 = dma.vmem_to_hbm [thread:$0]  %s56_s25, 32, %s58_s28, [#allocation3]  }
  0x8b   :  { %93 = dma.done.wait [#allocation3], 32  }
  0x8c   :  { %94 = vsyncadd [#allocation3], 4294967264 }
  0x8d   :  { %65 = vsyncpa [#allocation3], 1 }

</bundles_post_ra>
